<compile_context>
chip_gen: v6e
topology: v6e:2x2x1
jax: 0.10.0
libtpu: 0.0.40
codegen_flags: <defaults>
</compile_context>

<pallas_src>
import jax
import jax.numpy as jnp
from jax.experimental import pallas as pl
from jax.experimental.pallas import tpu as pltpu

EMB_DIM = 50
DICT_SIZE = 53 + 3 + 16  # 72


def _round_up(n, m):
    return ((n + m - 1) // m) * m


def _critic_kernel(tok_ref, w1c_ref, wh_ref, vec_ref, out_ref):
    """tok_ref:[BM,S] i32, w1c_ref:[S*DP,P] bf16 (emb folded into W1),
    wh_ref:[4,P,P] bf16 (W2..W5), vec_ref:[8,P] f32 (rows: b1..b5, w6 row, b6),
    out_ref:[BM,1] f32."""
    BM, S = tok_ref.shape
    KP = w1c_ref.shape[0]
    P = vec_ref.shape[1]
    DP = KP // S

    # ---- hidden_layer1 with fused embedding gather -------------------------
    #   emb[tok_s] @ W1_s == onehot(tok_s) @ (emb @ W1_s)  (exact: 0/1 select)
    # Per-position one-hots are concatenated along lanes so layer 1 is a
    # single long-K (K = S*DP) bf16 matmul on the MXU.
    lane_ids = jax.lax.broadcasted_iota(jnp.int32, (BM, DP), 1)
    pieces = [
        (lane_ids == tok_ref[:, s:s + 1]).astype(jnp.float32)
        for s in range(S)                      # S is small; static unroll
    ]
    onehot = jnp.concatenate(pieces, axis=1).astype(jnp.bfloat16)  # [BM, S*DP]

    h1 = jnp.dot(onehot, w1c_ref[...], preferred_element_type=jnp.float32)
    h1 = jnp.maximum(h1 + vec_ref[0:1, :], 0.0)                    # x1 (f32)

    def lin(x, w_idx, b_row):
        # bf16 MXU inputs, f32 accumulation, f32 bias add.
        return (jnp.dot(x.astype(jnp.bfloat16), wh_ref[w_idx],
                        preferred_element_type=jnp.float32)
                + vec_ref[b_row:b_row + 1, :])

    h2 = jnp.maximum(lin(h1, 0, 1), 0.0)                           # x2
    h3 = jnp.maximum(lin(h2, 1, 2), 0.0)                           # x3
    h4 = jnp.maximum(lin(h3, 2, 3) + h2, 0.0)                      # x4 = relu(.+x2)
    h5 = jnp.maximum(lin(h4, 3, 4) + h1, 0.0)                      # x5 = relu(.+x1)

    # ---- output_layer: N = 1 -> VPU multiply + lane reduce -----------------
    w6_row = vec_ref[5:6, :]
    b6 = vec_ref[6:7, 0:1]
    out_ref[...] = jnp.sum(h5 * w6_row, axis=-1, keepdims=True) + b6


def pack_params(params, input_size, hidden_size):
    """One-time packing of PyTorch-layout f32 params into padded operands.

    Folds the embedding table into W1 (f32 contraction) and stores all matmul
    weights in bf16; biases / w6 row / b6 stay f32 in one [8, P] slab."""
    S = input_size
    h1, h2, h3 = 4 * hidden_size, 2 * hidden_size, hidden_size
    P = _round_up(h1, 128)          # padded hidden lane width (128 for hidden=32)
    EP = _round_up(EMB_DIM, 128)    # 128
    DP = _round_up(DICT_SIZE, 128)  # 128

    emb_p = jnp.zeros((DP, EP), jnp.float32).at[:DICT_SIZE, :EMB_DIM].set(
        params["emb"])
    # W1 split per token position (matches row-major flatten of [B,S,EMB]).
    w1 = params["w1"].reshape(S, EMB_DIM, h1)
    w1_p = jnp.zeros((S, EP, P), jnp.float32).at[:, :EMB_DIM, :h1].set(w1)
    # Fold embedding into W1: w1c[s] = emb_p @ W1_s  -> [S, DP, P], flatten K.
    w1c = jnp.einsum("de,sep->sdp", emb_p, w1_p)
    w1c = w1c.reshape(S * DP, P).astype(jnp.bfloat16)

    wh = jnp.zeros((4, P, P), jnp.float32)
    wh = wh.at[0, :h1, :h2].set(params["w2"])
    wh = wh.at[1, :h2, :h3].set(params["w3"])
    wh = wh.at[2, :h3, :h2].set(params["w4"])
    wh = wh.at[3, :h2, :h1].set(params["w5"])
    wh = wh.astype(jnp.bfloat16)

    vec = jnp.zeros((8, P), jnp.float32)
    vec = vec.at[0, :h1].set(params["b1"][0])
    vec = vec.at[1, :h2].set(params["b2"][0])
    vec = vec.at[2, :h3].set(params["b3"][0])
    vec = vec.at[3, :h2].set(params["b4"][0])
    vec = vec.at[4, :h1].set(params["b5"][0])
    vec = vec.at[5, :h1].set(params["w6"][:, 0])
    vec = vec.at[6, 0].set(params["b6"][0, 0])

    return {"w1c": w1c, "wh": wh, "vec": vec,
            "S": S, "P": P, "DP": DP, "KP": S * DP}


def critic_forward(tokens, packed):
    """tokens: int32 [B, S]; packed: output of pack_params. Returns [B, 1] f32."""
    B, S = tokens.shape
    assert S == packed["S"]
    P, KP = packed["P"], packed["KP"]

    # cdiv batch tiling: pad B up, cap tile at 64 rows (vreg pressure),
    # shard tiles across TensorCores via the parallel grid axis.
    BM = min(_round_up(B, 8), 64)
    B_pad = _round_up(B, BM)
    if B_pad != B:
        tokens = jnp.pad(tokens, ((0, B_pad - B), (0, 0)))
    grid = (B_pad // BM,)

    out = pl.pallas_call(
        _critic_kernel,
        out_shape=jax.ShapeDtypeStruct((B_pad, 1), jnp.float32),
        grid=grid,
        in_specs=[
            pl.BlockSpec((BM, S), lambda i: (i, 0)),          # tokens
            pl.BlockSpec((KP, P), lambda i: (0, 0)),          # emb-folded W1 (bf16)
            pl.BlockSpec((4, P, P), lambda i: (0, 0, 0)),     # W2..W5 packed (bf16)
            pl.BlockSpec((8, P), lambda i: (0, 0)),           # biases + w6 row + b6
        ],
        out_specs=pl.BlockSpec((BM, 1), lambda i: (i, 0)),
        compiler_params=pltpu.CompilerParams(
            dimension_semantics=("parallel",)),
    )(tokens, packed["w1c"], packed["wh"], packed["vec"])
    return out[:B]


def init_params(key, input_size, hidden_size):
    """Deterministic synthetic init (PyTorch-style uniform fan-in bounds)."""
    d_in = input_size * EMB_DIM
    dims = [
        (d_in, hidden_size * 4),
        (hidden_size * 4, hidden_size * 2),
        (hidden_size * 2, hidden_size),
        (hidden_size, hidden_size * 2),
        (hidden_size * 2, hidden_size * 4),
        (hidden_size * 4, 1),
    ]
    keys = jax.random.split(key, 1 + 2 * len(dims))
    params = {"emb": jax.random.normal(keys[0], (DICT_SIZE, EMB_DIM), jnp.float32)}
    for i, (fin, fout) in enumerate(dims, start=1):
        bound = 1.0 / (fin ** 0.5)
        params[f"w{i}"] = jax.random.uniform(
            keys[2 * i - 1], (fin, fout), jnp.float32, -bound, bound)
        params[f"b{i}"] = jax.random.uniform(
            keys[2 * i], (1, fout), jnp.float32, -bound, bound)
    return params


def critic_reference(tokens, params):
    """Pure-JAX f32 reference mirroring the PyTorch forward."""
    B, S = tokens.shape
    x = jnp.take(params["emb"], tokens, axis=0).reshape(B, S * EMB_DIM)
    x1 = jax.nn.relu(x @ params["w1"] + params["b1"])
    x2 = jax.nn.relu(x1 @ params["w2"] + params["b2"])
    x3 = jax.nn.relu(x2 @ params["w3"] + params["b3"])
    x4 = jax.nn.relu(x3 @ params["w4"] + params["b4"] + x2)
    x5 = jax.nn.relu(x4 @ params["w5"] + params["b5"] + x1)
    return x5 @ params["w6"] + params["b6"]


if __name__ == "__main__":
    batch = 8
    input_size = 8      # sequence length of token ids
    hidden_size = 32

    key = jax.random.PRNGKey(0)
    k_tok, k_par = jax.random.split(key)
    tokens = jax.random.randint(k_tok, (batch, input_size), 0, DICT_SIZE,
                                dtype=jnp.int32)
    params = init_params(k_par, input_size, hidden_size)
    packed = pack_params(params, input_size, hidden_size)   # one-time packing

    out = critic_forward(tokens, packed)
    out = jax.block_until_ready(out)

    ref = critic_reference(tokens, params)
    assert out.shape == (batch, 1)
    # Weights are stored in bf16 (f32 accumulation), so compare against the
    # f32 reference at a tolerance consistent with bf16 weight quantization.
    assert jnp.allclose(out, ref, atol=2e-2, rtol=2e-2), (out, ref)
    print("KERNEL_OK")
</pallas_src>

<mosaic_0001>
module attributes {stable_mosaic.version = 11 : i64} {
  func.func @_critic_kernel(%arg0: i32, %arg1: memref<8x8xi32, #tpu.memory_space<vmem>>, %arg2: memref<1024x128xbf16, #tpu.memory_space<vmem>>, %arg3: memref<4x128x128xbf16, #tpu.memory_space<vmem>>, %arg4: memref<8x128xf32, #tpu.memory_space<vmem>>, %arg5: memref<8x1xf32, #tpu.memory_space<vmem>>) attributes {dimension_semantics = [#tpu.dimension_semantics<parallel>], iteration_bounds = array<i64: 1>, scalar_prefetch = 0 : i64, scratch_operands = 0 : i64, tpu.core_type = #tpu.core_type<tc>, window_params = [{transform_indices = @transform_0, window_bounds = array<i64: 8, 8>}, {pipeline_mode = #tpu.pipeline_mode<synchronous>, transform_indices = @transform_1, window_bounds = array<i64: 1024, 128>}, {pipeline_mode = #tpu.pipeline_mode<synchronous>, transform_indices = @transform_2, window_bounds = array<i64: 4, 128, 128>}, {pipeline_mode = #tpu.pipeline_mode<synchronous>, transform_indices = @transform_3, window_bounds = array<i64: 8, 128>}, {transform_indices = @transform_4, window_bounds = array<i64: 8, 1>}]} {
    %0 = tpu.iota {dimensions = array<i32: 1>} : vector<8x128xi32>
    %c0 = arith.constant 0 : index
    %c0_0 = arith.constant 0 : index
    %1 = vector.load %arg1[%c0, %c0_0] : memref<8x8xi32, #tpu.memory_space<vmem>>, vector<8x1xi32>
    %2 = vector.broadcast %1 : vector<8x1xi32> to vector<8x128xi32>
    %3 = arith.cmpi eq, %0, %2 : vector<8x128xi32>
    %4 = arith.extui %3 : vector<8x128xi1> to vector<8x128xi32>
    %5 = arith.sitofp %4 : vector<8x128xi32> to vector<8x128xf32>
    %c0_1 = arith.constant 0 : index
    %c1 = arith.constant 1 : index
    %6 = vector.load %arg1[%c0_1, %c1] : memref<8x8xi32, #tpu.memory_space<vmem>>, vector<8x1xi32>
    %7 = vector.broadcast %6 : vector<8x1xi32> to vector<8x128xi32>
    %8 = arith.cmpi eq, %0, %7 : vector<8x128xi32>
    %9 = arith.extui %8 : vector<8x128xi1> to vector<8x128xi32>
    %10 = arith.sitofp %9 : vector<8x128xi32> to vector<8x128xf32>
    %c0_2 = arith.constant 0 : index
    %c2 = arith.constant 2 : index
    %11 = vector.load %arg1[%c0_2, %c2] : memref<8x8xi32, #tpu.memory_space<vmem>>, vector<8x1xi32>
    %12 = vector.broadcast %11 : vector<8x1xi32> to vector<8x128xi32>
    %13 = arith.cmpi eq, %0, %12 : vector<8x128xi32>
    %14 = arith.extui %13 : vector<8x128xi1> to vector<8x128xi32>
    %15 = arith.sitofp %14 : vector<8x128xi32> to vector<8x128xf32>
    %c0_3 = arith.constant 0 : index
    %c3 = arith.constant 3 : index
    %16 = vector.load %arg1[%c0_3, %c3] : memref<8x8xi32, #tpu.memory_space<vmem>>, vector<8x1xi32>
    %17 = vector.broadcast %16 : vector<8x1xi32> to vector<8x128xi32>
    %18 = arith.cmpi eq, %0, %17 : vector<8x128xi32>
    %19 = arith.extui %18 : vector<8x128xi1> to vector<8x128xi32>
    %20 = arith.sitofp %19 : vector<8x128xi32> to vector<8x128xf32>
    %c0_4 = arith.constant 0 : index
    %c4 = arith.constant 4 : index
    %21 = vector.load %arg1[%c0_4, %c4] : memref<8x8xi32, #tpu.memory_space<vmem>>, vector<8x1xi32>
    %22 = vector.broadcast %21 : vector<8x1xi32> to vector<8x128xi32>
    %23 = arith.cmpi eq, %0, %22 : vector<8x128xi32>
    %24 = arith.extui %23 : vector<8x128xi1> to vector<8x128xi32>
    %25 = arith.sitofp %24 : vector<8x128xi32> to vector<8x128xf32>
    %c0_5 = arith.constant 0 : index
    %c5 = arith.constant 5 : index
    %26 = vector.load %arg1[%c0_5, %c5] : memref<8x8xi32, #tpu.memory_space<vmem>>, vector<8x1xi32>
    %27 = vector.broadcast %26 : vector<8x1xi32> to vector<8x128xi32>
    %28 = arith.cmpi eq, %0, %27 : vector<8x128xi32>
    %29 = arith.extui %28 : vector<8x128xi1> to vector<8x128xi32>
    %30 = arith.sitofp %29 : vector<8x128xi32> to vector<8x128xf32>
    %c0_6 = arith.constant 0 : index
    %c6 = arith.constant 6 : index
    %31 = vector.load %arg1[%c0_6, %c6] : memref<8x8xi32, #tpu.memory_space<vmem>>, vector<8x1xi32>
    %32 = vector.broadcast %31 : vector<8x1xi32> to vector<8x128xi32>
    %33 = arith.cmpi eq, %0, %32 : vector<8x128xi32>
    %34 = arith.extui %33 : vector<8x128xi1> to vector<8x128xi32>
    %35 = arith.sitofp %34 : vector<8x128xi32> to vector<8x128xf32>
    %c0_7 = arith.constant 0 : index
    %c7 = arith.constant 7 : index
    %36 = vector.load %arg1[%c0_7, %c7] : memref<8x8xi32, #tpu.memory_space<vmem>>, vector<8x1xi32>
    %37 = vector.broadcast %36 : vector<8x1xi32> to vector<8x128xi32>
    %38 = arith.cmpi eq, %0, %37 : vector<8x128xi32>
    %39 = arith.extui %38 : vector<8x128xi1> to vector<8x128xi32>
    %40 = arith.sitofp %39 : vector<8x128xi32> to vector<8x128xf32>
    %41 = tpu.concatenate %5, %10, %15, %20, %25, %30, %35, %40 in 1 : vector<8x128xf32>, vector<8x128xf32>, vector<8x128xf32>, vector<8x128xf32>, vector<8x128xf32>, vector<8x128xf32>, vector<8x128xf32>, vector<8x128xf32> -> vector<8x1024xf32>
    %42 = arith.truncf %41 : vector<8x1024xf32> to vector<8x1024xbf16>
    %c0_8 = arith.constant 0 : index
    %c0_9 = arith.constant 0 : index
    %43 = vector.load %arg2[%c0_8, %c0_9] : memref<1024x128xbf16, #tpu.memory_space<vmem>>, vector<1024x128xbf16>
    %cst = arith.constant dense<0.000000e+00> : vector<8x128xf32>
    %44 = tpu.matmul %42, %43, %cst {dimension_numbers = #tpu.dot_dimension_numbers<[1], [0], [0], [1], [0, 0, 1, 1], [], []>} : vector<8x1024xbf16>, vector<1024x128xbf16>, vector<8x128xf32> -> vector<8x128xf32>
    %c0_10 = arith.constant 0 : index
    %c0_11 = arith.constant 0 : index
    %45 = vector.load %arg4[%c0_10, %c0_11] : memref<8x128xf32, #tpu.memory_space<vmem>>, vector<1x128xf32>
    %46 = vector.broadcast %45 : vector<1x128xf32> to vector<8x128xf32>
    %47 = arith.addf %44, %46 : vector<8x128xf32>
    %cst_12 = arith.constant 0.000000e+00 : f32
    %48 = vector.broadcast %cst_12 : f32 to vector<8x128xf32>
    %49 = arith.maximumf %47, %48 : vector<8x128xf32>
    %50 = arith.truncf %49 : vector<8x128xf32> to vector<8x128xbf16>
    %c0_13 = arith.constant 0 : index
    %c0_14 = arith.constant 0 : index
    %c0_15 = arith.constant 0 : index
    %51 = vector.load %arg3[%c0_13, %c0_14, %c0_15] : memref<4x128x128xbf16, #tpu.memory_space<vmem>>, vector<1x128x128xbf16>
    %52 = vector.shape_cast %51 : vector<1x128x128xbf16> to vector<128x128xbf16>
    %cst_16 = arith.constant dense<0.000000e+00> : vector<8x128xf32>
    %53 = tpu.matmul %50, %52, %cst_16 {dimension_numbers = #tpu.dot_dimension_numbers<[1], [0], [0], [1], [0, 0, 1, 1], [], []>} : vector<8x128xbf16>, vector<128x128xbf16>, vector<8x128xf32> -> vector<8x128xf32>
    %c1_17 = arith.constant 1 : index
    %c0_18 = arith.constant 0 : index
    %54 = vector.load %arg4[%c1_17, %c0_18] : memref<8x128xf32, #tpu.memory_space<vmem>>, vector<1x128xf32>
    %55 = vector.broadcast %54 : vector<1x128xf32> to vector<8x128xf32>
    %56 = arith.addf %53, %55 : vector<8x128xf32>
    %cst_19 = arith.constant 0.000000e+00 : f32
    %57 = vector.broadcast %cst_19 : f32 to vector<8x128xf32>
    %58 = arith.maximumf %56, %57 : vector<8x128xf32>
    %59 = arith.truncf %58 : vector<8x128xf32> to vector<8x128xbf16>
    %c1_20 = arith.constant 1 : index
    %c0_21 = arith.constant 0 : index
    %c0_22 = arith.constant 0 : index
    %60 = vector.load %arg3[%c1_20, %c0_21, %c0_22] : memref<4x128x128xbf16, #tpu.memory_space<vmem>>, vector<1x128x128xbf16>
    %61 = vector.shape_cast %60 : vector<1x128x128xbf16> to vector<128x128xbf16>
    %cst_23 = arith.constant dense<0.000000e+00> : vector<8x128xf32>
    %62 = tpu.matmul %59, %61, %cst_23 {dimension_numbers = #tpu.dot_dimension_numbers<[1], [0], [0], [1], [0, 0, 1, 1], [], []>} : vector<8x128xbf16>, vector<128x128xbf16>, vector<8x128xf32> -> vector<8x128xf32>
    %c2_24 = arith.constant 2 : index
    %c0_25 = arith.constant 0 : index
    %63 = vector.load %arg4[%c2_24, %c0_25] : memref<8x128xf32, #tpu.memory_space<vmem>>, vector<1x128xf32>
    %64 = vector.broadcast %63 : vector<1x128xf32> to vector<8x128xf32>
    %65 = arith.addf %62, %64 : vector<8x128xf32>
    %cst_26 = arith.constant 0.000000e+00 : f32
    %66 = vector.broadcast %cst_26 : f32 to vector<8x128xf32>
    %67 = arith.maximumf %65, %66 : vector<8x128xf32>
    %68 = arith.truncf %67 : vector<8x128xf32> to vector<8x128xbf16>
    %c2_27 = arith.constant 2 : index
    %c0_28 = arith.constant 0 : index
    %c0_29 = arith.constant 0 : index
    %69 = vector.load %arg3[%c2_27, %c0_28, %c0_29] : memref<4x128x128xbf16, #tpu.memory_space<vmem>>, vector<1x128x128xbf16>
    %70 = vector.shape_cast %69 : vector<1x128x128xbf16> to vector<128x128xbf16>
    %cst_30 = arith.constant dense<0.000000e+00> : vector<8x128xf32>
    %71 = tpu.matmul %68, %70, %cst_30 {dimension_numbers = #tpu.dot_dimension_numbers<[1], [0], [0], [1], [0, 0, 1, 1], [], []>} : vector<8x128xbf16>, vector<128x128xbf16>, vector<8x128xf32> -> vector<8x128xf32>
    %c3_31 = arith.constant 3 : index
    %c0_32 = arith.constant 0 : index
    %72 = vector.load %arg4[%c3_31, %c0_32] : memref<8x128xf32, #tpu.memory_space<vmem>>, vector<1x128xf32>
    %73 = vector.broadcast %72 : vector<1x128xf32> to vector<8x128xf32>
    %74 = arith.addf %71, %73 : vector<8x128xf32>
    %75 = arith.addf %74, %58 : vector<8x128xf32>
    %cst_33 = arith.constant 0.000000e+00 : f32
    %76 = vector.broadcast %cst_33 : f32 to vector<8x128xf32>
    %77 = arith.maximumf %75, %76 : vector<8x128xf32>
    %78 = arith.truncf %77 : vector<8x128xf32> to vector<8x128xbf16>
    %c3_34 = arith.constant 3 : index
    %c0_35 = arith.constant 0 : index
    %c0_36 = arith.constant 0 : index
    %79 = vector.load %arg3[%c3_34, %c0_35, %c0_36] : memref<4x128x128xbf16, #tpu.memory_space<vmem>>, vector<1x128x128xbf16>
    %80 = vector.shape_cast %79 : vector<1x128x128xbf16> to vector<128x128xbf16>
    %cst_37 = arith.constant dense<0.000000e+00> : vector<8x128xf32>
    %81 = tpu.matmul %78, %80, %cst_37 {dimension_numbers = #tpu.dot_dimension_numbers<[1], [0], [0], [1], [0, 0, 1, 1], [], []>} : vector<8x128xbf16>, vector<128x128xbf16>, vector<8x128xf32> -> vector<8x128xf32>
    %c4_38 = arith.constant 4 : index
    %c0_39 = arith.constant 0 : index
    %82 = vector.load %arg4[%c4_38, %c0_39] : memref<8x128xf32, #tpu.memory_space<vmem>>, vector<1x128xf32>
    %83 = vector.broadcast %82 : vector<1x128xf32> to vector<8x128xf32>
    %84 = arith.addf %81, %83 : vector<8x128xf32>
    %85 = arith.addf %84, %49 : vector<8x128xf32>
    %cst_40 = arith.constant 0.000000e+00 : f32
    %86 = vector.broadcast %cst_40 : f32 to vector<8x128xf32>
    %87 = arith.maximumf %85, %86 : vector<8x128xf32>
    %c5_41 = arith.constant 5 : index
    %c0_42 = arith.constant 0 : index
    %88 = vector.load %arg4[%c5_41, %c0_42] : memref<8x128xf32, #tpu.memory_space<vmem>>, vector<1x128xf32>
    %c6_43 = arith.constant 6 : index
    %c0_44 = arith.constant 0 : index
    %89 = vector.load %arg4[%c6_43, %c0_44] : memref<8x128xf32, #tpu.memory_space<vmem>>, vector<1x1xf32>
    %90 = vector.broadcast %88 : vector<1x128xf32> to vector<8x128xf32>
    %91 = arith.mulf %87, %90 : vector<8x128xf32>
    %cst_45 = arith.constant dense<0.000000e+00> : vector<8xf32>
    %92 = vector.multi_reduction <add>, %91, %cst_45 [1] : vector<8x128xf32> to vector<8xf32>
    %93 = vector.shape_cast %92 : vector<8xf32> to vector<8x1xf32>
    %94 = vector.broadcast %89 : vector<1x1xf32> to vector<8x1xf32>
    %95 = arith.addf %93, %94 : vector<8x1xf32>
    %c0_46 = arith.constant 0 : index
    %c0_47 = arith.constant 0 : index
    %96 = vector.load %arg5[%c0_46, %c0_47] : memref<8x1xf32, #tpu.memory_space<vmem>>, vector<8x1xf32>
    tpu.vector_store %arg5[%c0_46, %c0_47], %95 {strides = array<i32>} : memref<8x1xf32, #tpu.memory_space<vmem>>, vector<8x1xf32>,
    return
  }
  func.func @transform_0(%arg0: i32) -> (i32, i32) {
    %c0_i32 = arith.constant 0 : i32
    %c0_i32_0 = arith.constant 0 : i32
    return %arg0, %c0_i32 : i32, i32
  }
  func.func @transform_1(%arg0: i32) -> (i32, i32) {
    %c0_i32 = arith.constant 0 : i32
    %c0_i32_0 = arith.constant 0 : i32
    %c0_i32_1 = arith.constant 0 : i32
    return %c0_i32, %c0_i32_0 : i32, i32
  }
  func.func @transform_2(%arg0: i32) -> (i32, i32, i32) {
    %c0_i32 = arith.constant 0 : i32
    %c0_i32_0 = arith.constant 0 : i32
    %c0_i32_1 = arith.constant 0 : i32
    %c0_i32_2 = arith.constant 0 : i32
    return %c0_i32, %c0_i32_0, %c0_i32_1 : i32, i32, i32
  }
  func.func @transform_3(%arg0: i32) -> (i32, i32) {
    %c0_i32 = arith.constant 0 : i32
    %c0_i32_0 = arith.constant 0 : i32
    %c0_i32_1 = arith.constant 0 : i32
    return %c0_i32, %c0_i32_0 : i32, i32
  }
  func.func @transform_4(%arg0: i32) -> (i32, i32) {
    %c0_i32 = arith.constant 0 : i32
    %c0_i32_0 = arith.constant 0 : i32
    return %arg0, %c0_i32 : i32, i32
  }
}

</mosaic_0001>

<bundles_post_ra>
// kernel: tpu_custom_call.1
= control target key start
LH: loop header
LB: loop body
LE: loop exit
PB: predicated region body
PF: predicated region fallthrough
CT: control target
= control target key end

     0   :  { %9 = vsyncpa [#allocation3], 0  ;;  %s1937_s0 = inlined_call_operand.hbm [shape: s32[8,8], index: 0, kind: input, shape index: {}]   ;;  %s1938_s1 = inlined_call_operand.hbm [shape: bf16[1024,128], index: 1, kind: input, shape index: {}]   ;;  %s1939_s2 = inlined_call_operand.hbm [shape: bf16[4,128,128], index: 2, kind: input, shape index: {}]   ;;  %s1940_s3 = inlined_call_operand.hbm [shape: f32[8,128], index: 3, kind: input, shape index: {}]   ;;  %s1941_s4 = inlined_call_operand.vmem [shape: f32[8,1], index: 4, kind: output, shape index: {}]  }
   0x1   :  { %10 = vsyncpa [#allocation5], 0 }
   0x2   :  { %11 = vsyncpa [#allocation8], 0  ;;  %s1817_s15 = smov [#allocation4]  }
   0x3   :  { %s27_s16 = sshll.u32 %s1817_s15, 4  ;;  %s28_s16 = int_to_ptr.vmem [resolvable:$true] %s27_s16 }
   0x4   :  { %s1739_s17 = scalar_lea.vmem %s28_s16, 8192  ;;  %p1744_p1 = scmp.lt.s32.totalorder %s28_s16, %s28_s16 }
   0x5   :  { %p1740_p0 = scmp.ne.s32.totalorder %s28_s16, %s1739_s17  ;;  %p1745_p2 = scmp.lt.s32.totalorder %s1739_s17, %s1739_s17 }
   0x7   :  { %p1746_p3 = por %p1745_p2, %p1744_p1 }
   0x9   :  { %p1747_p4 = pnand %p1746_p3, %p1740_p0 }
   0xb   :  { %1750 = shalt.err (!%p1747_p4)
}
   0xc   :  { %s1818_s18 = smov 64   ;;  %s1819_s19 = smov 4  }
   0xd   :  { %33 = dma.hbm_to_vmem [thread:$0]  %s1938_s1, 8192, %s28_s16, [#allocation5], %s1818_s18, %s1818_s18, %s1819_s19  }
   0xe   :  { %s1820_s22 = smov [#allocation2]   ;;  %s1821_s24 = smov [#allocation6]  }
   0xf   :  { %s18_s23 = sshll.u32 %s1820_s22, 4  ;;  %s39_s25 = sshll.u32 %s1821_s24, 4  ;;  %s19_s23 = int_to_ptr.vmem [resolvable:$true] %s18_s23  ;;  %s40_s25 = int_to_ptr.vmem [resolvable:$true] %s39_s25 }
  0x10   :  { %s1759_s26 = scalar_lea.vmem %s19_s23, 128  ;;  %p1764_p6 = scmp.lt.s32.totalorder %s19_s23, %s19_s23 }
  0x11   :  { %p1760_p5 = scmp.ne.s32.totalorder %s19_s23, %s1759_s26  ;;  %p1765_p7 = scmp.lt.s32.totalorder %s1759_s26, %s1759_s26 }
  0x13   :  { %p1766_p8 = por %p1765_p7, %p1764_p6 }
  0x15   :  { %p1767_p9 = pnand %p1766_p8, %p1760_p5 }
  0x17   :  { %1770 = shalt.err (!%p1767_p9)
}
  0x18   :  { %21 = dma.hbm_to_vmem [thread:$0]  %s1937_s0, 128, %s19_s23, [#allocation3]  }
  0x19   :  { %s1779_s29 = scalar_lea.vmem %s40_s25, 4096  ;;  %p1784_p11 = scmp.lt.s32.totalorder %s40_s25, %s40_s25 }
  0x1a   :  { %p1780_p10 = scmp.ne.s32.totalorder %s40_s25, %s1779_s29  ;;  %p1785_p12 = scmp.lt.s32.totalorder %s1779_s29, %s1779_s29 }
  0x1c   :  { %p1786_p13 = por %p1785_p12, %p1784_p11 }
  0x1e   :  { %p1787_p0 = pnand %p1786_p13, %p1780_p10 }
  0x20   :  { %1790 = shalt.err (!%p1787_p0)
}
  0x21   :  { %45 = dma.hbm_to_vmem [thread:$0]  %s1939_s2, 4096, %s40_s25, [#allocation5], %s1818_s18, %s1818_s18, %s1819_s19  }
  0x22   :  { %s1822_s5 = smov [#allocation7]  }
  0x23   :  { %s52_s6 = sshll.u32 %s1822_s5, 4  ;;  %s53_s6 = int_to_ptr.vmem [resolvable:$true] %s52_s6 }
  0x24   :  { %s1799_s7 = scalar_lea.vmem %s53_s6, 128  ;;  %p1804_p2 = scmp.lt.s32.totalorder %s53_s6, %s53_s6 }
  0x25   :  { %p1800_p1 = scmp.ne.s32.totalorder %s53_s6, %s1799_s7  ;;  %p1805_p3 = scmp.lt.s32.totalorder %s1799_s7, %s1799_s7 }
  0x27   :  { %p1806_p4 = por %p1805_p3, %p1804_p2 }
  0x29   :  { %p1807_p5 = pnand %p1806_p4, %p1800_p1 }
  0x2b   :  { %1810 = shalt.err (!%p1807_p5)
}
  0x2c   :  { %55 = dma.hbm_to_vmem [thread:$0]  %s1940_s3, 128, %s53_s6, [#allocation8]  }
  0x2d   :  { %1811 = dma.done.wait [#allocation3], 128  }
  0x2e   :  { %1812 = vsyncadd [#allocation3], 4294967168 }
  0x2f   :  { %1813 = dma.done.wait [#allocation5], 12288  }
  0x30   :  { %1814 = vsyncadd [#allocation5], 4294955008 }
  0x31   :  { %1815 = dma.done.wait [#allocation8], 128  }
  0x32   :  { %1816 = vsyncadd [#allocation8], 4294967168  ;;  %v1823_v0 = vmov 3   ;;  %v1824_v1 = vmov 1   ;;  %v71_v2 = vld [vmem:[#allocation2] sm:$0xff]  ;;  %v1825_v7 = vmov 2   ;;  %v69_v43 = vlaneseq }
  0x33   :  { %1628 = vset.pattern.permute.xlu1 %v1823_v0  ;;  %1626 = vset.pattern.permute.xlu0 %v1824_v1  ;;  %v1635_v3 = vld [vmem:[#allocation4 + $0x78] sm:$0xff]   ;;  %v1826_v8 = vmov 0   ;;  %v1639_v9 = vld [vmem:[#allocation4 + $0x70] sm:$0xff]   ;;  %v1643_v13 = vld [vmem:[#allocation4 + $0x68] sm:$0xff]   ;;  %v1827_v14 = vmov 5   ;;  %v1828_v15 = vmov 4  }
  0x34   :  { %91 = vperm.xlu1 %1628, %v71_v2   ;;  %79 = vperm.xlu0 %1626, %v71_v2   ;;  %v1636_v4 = vld [vmem:[#allocation4 + $0xf8] sm:$0xff]   ;;  %v1640_v10 = vld [vmem:[#allocation4 + $0xf0] sm:$0xff]   ;;  %v1644_v16 = vld [vmem:[#allocation4 + $0xe8] sm:$0xff]   ;;  %v1829_v21 = vmov 7   ;;  %v1830_v27 = vmov 6   ;;  %v1871_v44 = vand.u32 127, %v69_v43 }
  0x35   :  { %1405 = vmatprep.subr.bf16.mxu0 %v1635_v3  ;;  %v1637_v5 = vld [vmem:[#allocation4 + $0x38] sm:$0xff]   ;;  %1427 = vmatprep.subr.bf16.mxu1 %v1636_v4  ;;  %v1641_v11 = vld [vmem:[#allocation4 + $0x30] sm:$0xff]   ;;  %v1645_v17 = vld [vmem:[#allocation4 + $0x28] sm:$0xff]   ;;  %v1831_v47 = vmov 1.0|1.0  }
  0x36   :  { %v1638_v6 = vld [vmem:[#allocation4 + $0xb8] sm:$0xff]   ;;  %1406 = vmatpush3.bf16.msra.mxu0 %v1637_v5  ;;  %v1642_v12 = vld [vmem:[#allocation4 + $0xb0] sm:$0xff]   ;;  %v1646_v18 = vld [vmem:[#allocation4 + $0xa8] sm:$0xff]  }
  0x37   :  { %1428 = vmatpush3.bf16.msra.mxu1 %v1638_v6  ;;  %1407 = vmatprep.subr.bf16.mxu0 %v1639_v9  ;;  %v1647_v19 = vld [vmem:[#allocation4 + $0x60] sm:$0xff]   ;;  %v1651_v24 = vld [vmem:[#allocation4 + $0x58] sm:$0xff]   ;;  %v1655_v29 = vld [vmem:[#allocation4 + $0x50] sm:$0xff]  }
  0x38   :  { %1629 = vset.pattern.permute.xlu1 %v1825_v7  ;;  %1627 = vset.pattern.permute.xlu0 %v1826_v8  ;;  %v1648_v20 = vld [vmem:[#allocation4 + $0xe0] sm:$0xff]   ;;  %v1652_v25 = vld [vmem:[#allocation4 + $0xd8] sm:$0xff]   ;;  %v1656_v30 = vld [vmem:[#allocation4 + $0xd0] sm:$0xff]  }
  0x39   :  { %85 = vperm.xlu1 %1629, %v71_v2   ;;  %73 = vperm.xlu0 %1627, %v71_v2   ;;  %v1649_v22 = vld [vmem:[#allocation4 + $0x20] sm:$0xff]   ;;  %v1653_v26 = vld [vmem:[#allocation4 + $0x18] sm:$0xff]   ;;  %v1657_v31 = vld [vmem:[#allocation4 + $0x10] sm:$0xff]  }
  0x3a   :  { %1429 = vmatprep.subr.bf16.mxu1 %v1640_v10  ;;  %1408 = vmatpush3.bf16.msra.mxu0 %v1641_v11  ;;  %v1650_v23 = vld [vmem:[#allocation4 + $0xa0] sm:$0xff]   ;;  %v1654_v28 = vld [vmem:[#allocation4 + $0x98] sm:$0xff]   ;;  %v1658_v32 = vld [vmem:[#allocation4 + $0x90] sm:$0xff]  }
  0x3b   :  { %1430 = vmatpush3.bf16.msra.mxu1 %v1642_v12  ;;  %1409 = vmatprep.subr.bf16.mxu0 %v1643_v13  ;;  %v1659_v33 = vld [vmem:[#allocation4 + $0x48] sm:$0xff]   ;;  %v1663_v37 = vld [vmem:[#allocation4 + $0x40] sm:$0xff]   ;;  %v1667_v41 = vld [vmem:[#allocation4 + $0x178] sm:$0xff]  }
  0x3c   :  { %1431 = vmatprep.subr.bf16.mxu1 %v1644_v16  ;;  %v1660_v34 = vld [vmem:[#allocation4 + $0xc8] sm:$0xff]   ;;  %v1664_v38 = vld [vmem:[#allocation4 + $0xc0] sm:$0xff]   ;;  %v1668_v42 = vld [vmem:[#allocation4 + $0x1f8] sm:$0xff]  }
  0x3d   :  { %1630 = vset.pattern.permute.xlu1 %v1827_v14  ;;  %1631 = vset.pattern.permute.xlu0 %v1828_v15  ;;  %v1661_v35 = vld [vmem:[#allocation4 + $0x8] sm:$0xff]   ;;  %v1665_v39 = vld [vmem:[#allocation4] sm:$0xff]   ;;  %v1670_v50 = vld [vmem:[#allocation4 + $0x1b8] sm:$0xff]  }
  0x3e   :  { %103 = vperm.xlu1 %1630, %v71_v2   ;;  %97 = vperm.xlu0 %1631, %v71_v2   ;;  %v1662_v36 = vld [vmem:[#allocation4 + $0x88] sm:$0xff]   ;;  %v1666_v40 = vld [vmem:[#allocation4 + $0x80] sm:$0xff]   ;;  %v1669_v51 = vld [vmem:[#allocation4 + $0x138] sm:$0xff]  }
  0x3f   :  { %1410 = vmatpush3.bf16.msra.mxu0 %v1645_v17  ;;  %1432 = vmatpush3.bf16.msra.mxu1 %v1646_v18  ;;  %v1672_v52 = vld [vmem:[#allocation4 + $0x1f0] sm:$0xff]   ;;  %v1676_v56 = vld [vmem:[#allocation4 + $0x1e8] sm:$0xff]   ;;  %v1680_v61 = vld [vmem:[#allocation4 + $0x1e0] sm:$0xff]  }
  0x40   :  { %1411 = vmatprep.subr.bf16.mxu0 %v1647_v19  ;;  %1433 = vmatprep.subr.bf16.mxu1 %v1648_v20  ;;  %v1671_v53 = vld [vmem:[#allocation4 + $0x170] sm:$0xff]   ;;  %v1675_v58 = vld [vmem:[#allocation4 + $0x168] sm:$0xff]   ;;  %v1679_v62 = vld [vmem:[#allocation4 + $0x160] sm:$0xff]  }
  0x41   :  { %v1674_v54 = vld [vmem:[#allocation4 + $0x1b0] sm:$0xff]   ;;  %v1678_v59 = vld [vmem:[#allocation4 + $0x1a8] sm:$0xff]   ;;  %v1682_v0 = vld [vmem:[#allocation4 + $0x1a0] sm:$0xff]  }
  0x42   :  { %1632 = vset.pattern.permute.xlu1 %v1829_v21  ;;  %1634 = vset.pattern.permute.xlu0 %v1829_v21  ;;  %v1673_v55 = vld [vmem:[#allocation4 + $0x130] sm:$0xff]   ;;  %v1677_v60 = vld [vmem:[#allocation4 + $0x128] sm:$0xff]   ;;  %v1681_v1 = vld [vmem:[#allocation4 + $0x120] sm:$0xff]   ;;  %v1832_v21 = vmov 0.0  }
  0x43   :  { %115 = vperm.xlu1 %1632, %v71_v2   ;;  %1412 = vmatpush3.bf16.msra.mxu0 %v1649_v22  ;;  %v1683_v3 = vld [vmem:[#allocation4 + $0x158] sm:$0xff]   ;;  %v1688_v6 = vld [vmem:[#allocation4 + $0x1d0] sm:$0xff]   ;;  %v1692_v10 = vld [vmem:[#allocation4 + $0x1c8] sm:$0xff]  }
  0x44   :  { %1434 = vmatpush3.bf16.msra.mxu1 %v1650_v23  ;;  %1413 = vmatprep.subr.bf16.mxu0 %v1651_v24  ;;  %v1686_v4 = vld [vmem:[#allocation4 + $0x198] sm:$0xff]   ;;  %v1687_v7 = vld [vmem:[#allocation4 + $0x150] sm:$0xff]   ;;  %v1691_v11 = vld [vmem:[#allocation4 + $0x148] sm:$0xff]  }
  0x45   :  { %1435 = vmatprep.subr.bf16.mxu1 %v1652_v25  ;;  %v1685_v5 = vld [vmem:[#allocation4 + $0x118] sm:$0xff]   ;;  %v1689_v8 = vld [vmem:[#allocation4 + $0x190] sm:$0xff]   ;;  %v1693_v12 = vld [vmem:[#allocation4 + $0x188] sm:$0xff]  }
  0x46   :  { %v1690_v9 = vld [vmem:[#allocation4 + $0x110] sm:$0xff]   ;;  %v1694_v13 = vld [vmem:[#allocation4 + $0x108] sm:$0xff]   ;;  %v1696_v14 = vld [vmem:[#allocation4 + $0x1c0] sm:$0xff]  }
  0x47   :  { %1633 = vset.pattern.permute.xlu1 %v1830_v27  ;;  %1414 = vmatpush3.bf16.msra.mxu0 %v1653_v26  ;;  %v1695_v15 = vld [vmem:[#allocation4 + $0x140] sm:$0xff]   ;;  %v1699_v20 = vld [vmem:[#allocation6 + $0x38] sm:$0xff]   ;;  %v1700_v22 = vld [vmem:[#allocation6 + $0x30] sm:$0xff]  }
  0x48   :  { %109 = vperm.xlu1 %1633, %v71_v2   ;;  %1436 = vmatpush3.bf16.msra.mxu1 %v1654_v28  ;;  %v1684_v2 = vld [vmem:[#allocation4 + $0x1d8] sm:$0xff]   ;;  %v1697_v18 = vld [vmem:[#allocation4 + $0x180] sm:$0xff]   ;;  %v1701_v23 = vld [vmem:[#allocation6 + $0x28] sm:$0xff]  }
  0x49   :  { %1415 = vmatprep.subr.bf16.mxu0 %v1655_v29  ;;  %1437 = vmatprep.subr.bf16.mxu1 %v1656_v30  ;;  %v1698_v19 = vld [vmem:[#allocation4 + $0x100] sm:$0xff]   ;;  %v1703_v25 = vld [vmem:[#allocation6 + $0x18] sm:$0xff]   ;;  %v1704_v26 = vld [vmem:[#allocation6 + $0x10] sm:$0xff]  }
  0x4a   :  { %v1702_v24 = vld [vmem:[#allocation6 + $0x20] sm:$0xff]   ;;  %v1705_v27 = vld [vmem:[#allocation6 + $0x8] sm:$0xff]   ;;  %v1707_v29 = vld [vmem:[#allocation6 + $0x78] sm:$0xff]  }
  0x4b   :  { %1416 = vmatpush3.bf16.msra.mxu0 %v1657_v31  ;;  %v1706_v28 = vld [vmem:[#allocation6] sm:$0xff]   ;;  %v1708_v30 = vld [vmem:[#allocation6 + $0x70] sm:$0xff]   ;;  %v1709_v31 = vld [vmem:[#allocation6 + $0x68] sm:$0xff]  }
  0x4c   :  { %1438 = vmatpush3.bf16.msra.mxu1 %v1658_v32  ;;  %1417 = vmatprep.subr.bf16.mxu0 %v1659_v33  ;;  %v1710_v32 = vld [vmem:[#allocation6 + $0x60] sm:$0xff]   ;;  %v1711_v33 = vld [vmem:[#allocation6 + $0x58] sm:$0xff]  }
  0x4d   :  { %1439 = vmatprep.subr.bf16.mxu1 %v1660_v34  ;;  %v1712_v34 = vld [vmem:[#allocation6 + $0x50] sm:$0xff]  }
  0x4f   :  { %1418 = vmatpush3.bf16.msra.mxu0 %v1661_v35 }
  0x50   :  { %1440 = vmatpush3.bf16.msra.mxu1 %v1662_v36  ;;  %1419 = vmatprep.subr.bf16.mxu0 %v1663_v37 }
  0x51   :  { %1441 = vmatprep.subr.bf16.mxu1 %v1664_v38 }
  0x53   :  { %1420 = vmatpush3.bf16.msra.mxu0 %v1665_v39 }
  0x54   :  { %1442 = vmatpush3.bf16.msra.mxu1 %v1666_v40  ;;  %1449 = vmatprep.subr.bf16.mxu0 %v1667_v41 }
  0x55   :  { %1471 = vmatprep.subr.bf16.mxu1 %v1668_v42 }
  0xaf   :  { %v80_v45 = vpop.permute.xlu0 %79  ;;  %v92_v46 = vpop.permute.xlu1 %91 }
  0xb0   :  { %vm81_vm0 = vcmp.eq.s32.totalorder %v1871_v44, %v80_v45  ;;  %vm93_vm1 = vcmp.eq.s32.totalorder %v1871_v44, %v92_v46 }
  0xb1   :  { %vm1351_vm2 = vmpackc.low %vm81_vm0, %vm81_vm0  ;;  %vm1833_vm0 = vmmov 0  }
  0xb2   :  { %1352 = vmatprep.mubr.msk.bf16.mxu0 %vm1351_vm2, %v1831_v47  ;;  %vm1355_vm3 = vmpackc.low %vm93_vm1, %vm93_vm1  ;;  %vm1269_vm1 = vcmask 7168  }
  0xb3   :  { %1356 = vmatprep.mubr.msk.bf16.mxu1 %vm1355_vm3, %v1831_v47 }
  0xb4   :  { %v86_v48 = vpop.permute.xlu1 %85  ;;  %v74_v49 = vpop.permute.xlu0 %73 }
  0xb5   :  { %vm87_vm4 = vcmp.eq.s32.totalorder %v1871_v44, %v86_v48  ;;  %vm75_vm5 = vcmp.eq.s32.totalorder %v1871_v44, %v74_v49 }
  0xb6   :  { %vm1357_vm6 = vmpackc.low %vm87_vm4, %vm87_vm4 }
  0xb7   :  { %vm1353_vm7 = vmpackc.low %vm75_vm5, %vm75_vm5  ;;  %1358 = vmatmul.mubr.msk.bf16.vlgmr.msra.gmra.mxu1 %vm1357_vm6, %v1831_v47 }
  0xb8   :  { %1354 = vmatmul.mubr.msk.bf16.vlgmr.msra.gmra.mxu0 %vm1353_vm7, %v1831_v47  ;;  %1472 = vmatpush3.bf16.msra.mxu1 %v1670_v50 }
  0xb9   :  { %1450 = vmatpush3.bf16.msra.mxu0 %v1669_v51  ;;  %1473 = vmatprep.subr.bf16.mxu1 %v1672_v52  ;;  %v104_v57 = vpop.permute.xlu1 %103  ;;  %v98_v17 = vpop.permute.xlu0 %97 }
  0xba   :  { %1451 = vmatprep.subr.bf16.mxu0 %v1671_v53  ;;  %vm105_vm8 = vcmp.eq.s32.totalorder %v1871_v44, %v104_v57  ;;  %vm99_vm13 = vcmp.eq.s32.totalorder %v1871_v44, %v98_v17  ;;  %v1724_v17 = vld [vmem:[#allocation6 + $0xf0] sm:$0xff]  }
  0xbb   :  { %vm1359_vm9 = vmpackc.low %vm105_vm8, %vm105_vm8 }
  0xbc   :  { %1474 = vmatpush3.bf16.msra.mxu1 %v1674_v54  ;;  %1360 = vmatprep.mubr.msk.bf16.mxu0 %vm1359_vm9, %v1831_v47  ;;  %vm1361_vm15 = vmpackc.low %vm99_vm13, %vm99_vm13 }
  0xbd   :  { %1452 = vmatpush3.bf16.msra.mxu0 %v1673_v55  ;;  %1475 = vmatprep.subr.bf16.mxu1 %v1676_v56 }
  0xbe   :  { %1453 = vmatprep.subr.bf16.mxu0 %v1675_v58  ;;  %v116_v63 = vpop.permute.xlu1 %115 }
  0xbf   :  { %vm117_vm10 = vcmp.eq.s32.totalorder %v1871_v44, %v116_v63  ;;  %v1714_v63 = vld [vmem:[#allocation6 + $0x40] sm:$0xff]  }
  0xc0   :  { %1476 = vmatpush3.bf16.msra.mxu1 %v1678_v59  ;;  %vm1363_vm11 = vmpackc.low %vm117_vm10, %vm117_vm10 }
  0xc1   :  { %1454 = vmatpush3.bf16.msra.mxu0 %v1677_v60  ;;  %1477 = vmatprep.subr.bf16.mxu1 %v1680_v61 }
  0xc2   :  { %1455 = vmatprep.subr.bf16.mxu0 %v1679_v62  ;;  %1364 = vmatprep.mubr.msk.bf16.mxu1 %vm1363_vm11, %v1831_v47  ;;  %v1713_v62 = vld [vmem:[#allocation6 + $0x48] sm:$0xff]  }
  0xc3   :  { %v110_v16 = vpop.permute.xlu1 %109 }
  0xc4   :  { %1478 = vmatpush3.bf16.msra.mxu1 %v1682_v0  ;;  %vm111_vm12 = vcmp.eq.s32.totalorder %v1871_v44, %v110_v16  ;;  %v1286_v44 = vld [vmem:[#allocation7] ss:$0 sm:$0xff]  ;;  %v1715_v0 = vld [vmem:[#allocation6 + $0xb8] sm:$0xff]  }
  0xc5   :  { %1456 = vmatpush3.bf16.msra.mxu0 %v1681_v1  ;;  %1479 = vmatprep.subr.bf16.mxu1 %v1684_v2  ;;  %vm1365_vm14 = vmpackc.low %vm111_vm12, %vm111_vm12  ;;  %v1716_v1 = vld [vmem:[#allocation6 + $0xb0] sm:$0xff]   ;;  %v1717_v2 = vld [vmem:[#allocation6 + $0xa8] sm:$0xff]  }
  0xc6   :  { %1457 = vmatprep.subr.bf16.mxu0 %v1683_v3  ;;  %v1718_v3 = vld [vmem:[#allocation6 + $0xa0] sm:$0xff]   ;;  %v1723_v16 = vld [vmem:[#allocation6 + $0xf8] sm:$0xff]  }
  0xc8   :  { %1480 = vmatpush3.bf16.msra.mxu1 %v1686_v4  ;;  %v1719_v4 = vld [vmem:[#allocation6 + $0x98] sm:$0xff]  }
  0xc9   :  { %1458 = vmatpush3.bf16.msra.mxu0 %v1685_v5  ;;  %1481 = vmatprep.subr.bf16.mxu1 %v1688_v6  ;;  %v1720_v5 = vld [vmem:[#allocation6 + $0x90] sm:$0xff]   ;;  %v1367_v6 = vld [vmem:[#allocation7 + $0x1] ss:$0 sm:$0xff] }
  0xca   :  { %1459 = vmatprep.subr.bf16.mxu0 %v1687_v7 }
  0xcc   :  { %1482 = vmatpush3.bf16.msra.mxu1 %v1689_v8 }
  0xcd   :  { %1460 = vmatpush3.bf16.msra.mxu0 %v1690_v9  ;;  %1483 = vmatprep.subr.bf16.mxu1 %v1692_v10 }
  0xce   :  { %1461 = vmatprep.subr.bf16.mxu0 %v1691_v11 }
  0xd0   :  { %1484 = vmatpush3.bf16.msra.mxu1 %v1693_v12 }
  0xd1   :  { %1462 = vmatpush3.bf16.msra.mxu0 %v1694_v13  ;;  %1485 = vmatprep.subr.bf16.mxu1 %v1696_v14  ;;  %v1721_v14 = vld [vmem:[#allocation6 + $0x88] sm:$0xff]  }
  0xd2   :  { %1463 = vmatprep.subr.bf16.mxu0 %v1695_v15  ;;  %v1722_v15 = vld [vmem:[#allocation6 + $0x80] sm:$0xff]  }
  0xd4   :  { %1486 = vmatpush3.bf16.msra.mxu1 %v1697_v18  ;;  %v1725_v18 = vld [vmem:[#allocation6 + $0xe8] sm:$0xff]  }
  0xd5   :  { %1464 = vmatpush3.bf16.msra.mxu0 %v1698_v19  ;;  %1549 = vmatprep.subr.bf16.mxu1 %v1832_v21  ;;  %v1726_v19 = vld [vmem:[#allocation6 + $0xe0] sm:$0xff]  }
  0xd6   :  { %1529 = vmatprep.subr.bf16.mxu0 %v1832_v21 }
  0xd7   :  { %1366 = vmatmul.mubr.msk.bf16.vlgmr.msra.gmra.mxu1 %vm1365_vm14, %v1831_v47 }
  0xd8   :  { %1362 = vmatmul.mubr.msk.bf16.vlgmr.msra.gmra.mxu0 %vm1361_vm15, %v1831_v47  ;;  %1565 = vmatprep.mubr.msk.bf16.mxu1 %vm1833_vm0, %v1832_v21 }
  0xd9   :  { %1530 = vmatpush3.bf16.msra.mxu0 %v1699_v20  ;;  %1545 = vmatprep.mubr.msk.bf16.mxu0 %vm1833_vm0, %v1832_v21  ;;  %v1727_v20 = vld [vmem:[#allocation6 + $0xd8] sm:$0xff]  }
  0xda   :  { %1531 = vmatprep.subr.bf16.mxu0 %v1832_v21  ;;  %1550 = vmatpush3.bf16.msra.mxu1 %v1707_v29 }
  0xdb   :  { %1551 = vmatprep.subr.bf16.mxu1 %v1832_v21 }
  0xdd   :  { %1532 = vmatpush3.bf16.msra.mxu0 %v1700_v22  ;;  %v1728_v22 = vld [vmem:[#allocation6 + $0xd0] sm:$0xff]  }
  0xde   :  { %1533 = vmatprep.subr.bf16.mxu0 %v1832_v21  ;;  %1552 = vmatpush3.bf16.msra.mxu1 %v1708_v30 }
  0xdf   :  { %1553 = vmatprep.subr.bf16.mxu1 %v1832_v21 }
  0xe1   :  { %1534 = vmatpush3.bf16.msra.mxu0 %v1701_v23  ;;  %v1376_v23 = vld [vmem:[#allocation7 + $0x2] ss:$0 sm:$0xff] }
  0xe2   :  { %1535 = vmatprep.subr.bf16.mxu0 %v1832_v21  ;;  %1554 = vmatpush3.bf16.msra.mxu1 %v1709_v31  ;;  %v1729_v31 = vld [vmem:[#allocation6 + $0xc8] sm:$0xff]  }
  0xe3   :  { %1555 = vmatprep.subr.bf16.mxu1 %v1832_v21 }
  0xe5   :  { %1536 = vmatpush3.bf16.msra.mxu0 %v1702_v24 }
  0xe6   :  { %1537 = vmatprep.subr.bf16.mxu0 %v1832_v21  ;;  %1556 = vmatpush3.bf16.msra.mxu1 %v1710_v32  ;;  %v1730_v32 = vld [vmem:[#allocation6 + $0xc0] sm:$0xff]  }
  0xe7   :  { %1557 = vmatprep.subr.bf16.mxu1 %v1832_v21 }
  0xe9   :  { %1538 = vmatpush3.bf16.msra.mxu0 %v1703_v25 }
  0xea   :  { %1539 = vmatprep.subr.bf16.mxu0 %v1832_v21  ;;  %1558 = vmatpush3.bf16.msra.mxu1 %v1711_v33  ;;  %v1385_v33 = vld [vmem:[#allocation7 + $0x3] ss:$0 sm:$0xff] }
  0xeb   :  { %1559 = vmatprep.subr.bf16.mxu1 %v1832_v21 }
  0xed   :  { %1540 = vmatpush3.bf16.msra.mxu0 %v1704_v26 }
  0xee   :  { %1541 = vmatprep.subr.bf16.mxu0 %v1832_v21  ;;  %1560 = vmatpush3.bf16.msra.mxu1 %v1712_v34 }
  0xef   :  { %1561 = vmatprep.subr.bf16.mxu1 %v1832_v21 }
  0xf1   :  { %1542 = vmatpush3.bf16.msra.mxu0 %v1705_v27 }
  0xf2   :  { %1543 = vmatprep.subr.bf16.mxu0 %v1832_v21  ;;  %1562 = vmatpush3.bf16.msra.mxu1 %v1713_v62 }
  0xf3   :  { %1563 = vmatprep.subr.bf16.mxu1 %v1832_v21 }
  0xf5   :  { %1544 = vmatpush3.bf16.msra.mxu0 %v1706_v28 }
  0xf6   :  { %1569 = vmatprep.subr.bf16.mxu0 %v1832_v21  ;;  %1564 = vmatpush3.bf16.msra.mxu1 %v1714_v63 }
  0xf7   :  { %1589 = vmatprep.subr.bf16.mxu1 %v1832_v21 }
 0x177   :  { %v1443_v35 = vpop.f32.mrf.mxu1 }
 0x178   :  { %v1421_v36 = vpop.f32.mrf.mxu0 }
 0x179   :  { %v1444_v37 = vpop.f32.mrf.mxu1 }
 0x17a   :  { %v1422_v38 = vpop.f32.mrf.mxu0  ;;  %v1445_v48 = vadd.f32 %v1444_v37, %v1443_v35 }
 0x17b   :  { %v1446_v39 = vpop.f32.mrf.mxu1  ;;  %v1423_v43 = vadd.f32 %v1422_v38, %v1421_v36 }
 0x17c   :  { %v1424_v40 = vpop.f32.mrf.mxu0 }
 0x17d   :  { %v1447_v41 = vpop.f32.mrf.mxu1  ;;  %v680_v45 = vadd.f32 %v1423_v43, %v1286_v44 }
 0x17e   :  { %v1425_v42 = vpop.f32.mrf.mxu0 }
 0x17f   :  { %v720_v51 = vadd.f32 %v1445_v48, %v680_v45  ;;  %v1394_v42 = vld [vmem:[#allocation7 + $0x4] ss:$0 sm:$0xff] }
 0x197   :  { %v1487_v46 = vpop.f32.mrf.mxu1 }
 0x198   :  { %v1465_v47 = vpop.f32.mrf.mxu0 }
 0x199   :  { %v1488_v49 = vpop.f32.mrf.mxu1 }
 0x19a   :  { %v1466_v50 = vpop.f32.mrf.mxu0  ;;  %v1489_v56 = vadd.f32 %v1488_v49, %v1487_v46 }
 0x19b   :  { %v1467_v52 = vadd.f32 %v1466_v50, %v1465_v47  ;;  %v1490_v53 = vpop.f32.mrf.mxu1 }
 0x19c   :  { %v1468_v54 = vpop.f32.mrf.mxu0 }
 0x19d   :  { %v760_v55 = vadd.f32 %v1467_v52, %v720_v51  ;;  %v1491_v57 = vpop.f32.mrf.mxu1  ;;  %v1404_v51 = vld [vmem:[#allocation7 + $0x6] ss:$0 sm:$0xff] }
 0x19e   :  { %v1469_v58 = vpop.f32.mrf.mxu0 }
 0x19f   :  { %v800_v59 = vadd.f32 %v1489_v56, %v760_v55 }
 0x1a1   :  { %v1909_v60 = vmax.f32 %v800_v59, 0.0 }
 0x1a3   :  { %v806_v61 = vpack.c.bf16 %v1909_v60, %v1909_v60 }
 0x1a5   :  { %1546 = vmatmul.mubr.bf16.vlgmr.msra.gmra.mxu0 %v806_v61 }
 0x1a6   :  { %1585 = vmatprep.mubr.msk.bf16.mxu0 %vm1833_vm0, %v1832_v21  ;;  %1570 = vmatpush3.bf16.msra.mxu0 %v1715_v0 }
 0x1a7   :  { %1571 = vmatprep.subr.bf16.mxu0 %v1832_v21 }
 0x1aa   :  { %1572 = vmatpush3.bf16.msra.mxu0 %v1716_v1 }
 0x1ab   :  { %1573 = vmatprep.subr.bf16.mxu0 %v1832_v21 }
 0x1ae   :  { %1574 = vmatpush3.bf16.msra.mxu0 %v1717_v2 }
 0x1af   :  { %1575 = vmatprep.subr.bf16.mxu0 %v1832_v21 }
 0x1b2   :  { %1576 = vmatpush3.bf16.msra.mxu0 %v1718_v3 }
 0x1b3   :  { %1577 = vmatprep.subr.bf16.mxu0 %v1832_v21 }
 0x1b6   :  { %1578 = vmatpush3.bf16.msra.mxu0 %v1719_v4 }
 0x1b7   :  { %1579 = vmatprep.subr.bf16.mxu0 %v1832_v21 }
 0x1ba   :  { %1580 = vmatpush3.bf16.msra.mxu0 %v1720_v5 }
 0x1bb   :  { %1581 = vmatprep.subr.bf16.mxu0 %v1832_v21 }
 0x1be   :  { %1582 = vmatpush3.bf16.msra.mxu0 %v1721_v14 }
 0x1bf   :  { %1583 = vmatprep.subr.bf16.mxu0 %v1832_v21 }
 0x1c2   :  { %1584 = vmatpush3.bf16.msra.mxu0 %v1722_v15 }
 0x265   :  { %v910_v7 = vpop.f32.mrf.mxu0 }
 0x266   :  { %v911_v8 = vadd.f32 %v1367_v6, %v910_v7 }
 0x267   :  { %v1547_v9 = vpop.f32.mrf.mxu0 }
 0x268   :  { %v916_v10 = vmax.f32 %v911_v8, 0.0 }
 0x269   :  { %v913_v11 = vpop.f32.mrf.mxu0 }
 0x26a   :  { %v917_v12 = vpack.c.bf16 %v916_v10, %v916_v10 }
 0x26b   :  { %v1548_v13 = vpop.f32.mrf.mxu0 }
 0x26c   :  { %1566 = vmatmul.mubr.bf16.vlgmr.msra.gmra.mxu1 %v917_v12 }
 0x26d   :  { %1605 = vmatprep.mubr.msk.bf16.mxu1 %vm1833_vm0, %v1832_v21  ;;  %1590 = vmatpush3.bf16.msra.mxu1 %v1723_v16 }
 0x26e   :  { %1591 = vmatprep.subr.bf16.mxu1 %v1832_v21 }
 0x271   :  { %1592 = vmatpush3.bf16.msra.mxu1 %v1724_v17 }
 0x272   :  { %1593 = vmatprep.subr.bf16.mxu1 %v1832_v21 }
 0x275   :  { %1594 = vmatpush3.bf16.msra.mxu1 %v1725_v18 }
 0x276   :  { %1595 = vmatprep.subr.bf16.mxu1 %v1832_v21 }
 0x279   :  { %1596 = vmatpush3.bf16.msra.mxu1 %v1726_v19 }
 0x27a   :  { %1597 = vmatprep.subr.bf16.mxu1 %v1832_v21 }
 0x27d   :  { %1598 = vmatpush3.bf16.msra.mxu1 %v1727_v20 }
 0x27e   :  { %1599 = vmatprep.subr.bf16.mxu1 %v1832_v21 }
 0x281   :  { %1600 = vmatpush3.bf16.msra.mxu1 %v1728_v22 }
 0x282   :  { %1601 = vmatprep.subr.bf16.mxu1 %v1832_v21 }
 0x285   :  { %1602 = vmatpush3.bf16.msra.mxu1 %v1729_v31 }
 0x286   :  { %1603 = vmatprep.subr.bf16.mxu1 %v1832_v21  ;;  %v1403_v21 = vld [vmem:[#allocation7 + $0x5] ss:$0 sm:$0xff] }
 0x289   :  { %1604 = vmatpush3.bf16.msra.mxu1 %v1730_v32 }
 0x32c   :  { %v1022_v24 = vpop.f32.mrf.mxu1 }
 0x32d   :  { %v1023_v25 = vadd.f32 %v1376_v23, %v1022_v24 }
 0x32e   :  { %v1567_v26 = vpop.f32.mrf.mxu1 }
 0x32f   :  { %v1028_v27 = vmax.f32 %v1023_v25, 0.0 }
 0x330   :  { %v1025_v28 = vpop.f32.mrf.mxu1 }
 0x331   :  { %v1029_v29 = vpack.c.bf16 %v1028_v27, %v1028_v27 }
 0x332   :  { %v1568_v30 = vpop.f32.mrf.mxu1 }
 0x333   :  { %1586 = vmatmul.mubr.bf16.vlgmr.msra.gmra.mxu0 %v1029_v29 }
 0x3f3   :  { %v1134_v34 = vpop.f32.mrf.mxu0 }
 0x3f4   :  { %v1135_v35 = vadd.f32 %v1385_v33, %v1134_v34 }
 0x3f5   :  { %v1587_v36 = vpop.f32.mrf.mxu0 }
 0x3f6   :  { %v1140_v37 = vadd.f32 %v1135_v35, %v916_v10 }
 0x3f7   :  { %v1137_v38 = vpop.f32.mrf.mxu0 }
 0x3f8   :  { %v1141_v39 = vmax.f32 %v1140_v37, 0.0 }
 0x3f9   :  { %v1588_v40 = vpop.f32.mrf.mxu0 }
 0x3fa   :  { %v1142_v41 = vpack.c.bf16 %v1141_v39, %v1141_v39 }
 0x3fc   :  { %1606 = vmatmul.mubr.bf16.vlgmr.msra.gmra.mxu1 %v1142_v41 }
 0x4bc   :  { %v1247_v43 = vpop.f32.mrf.mxu1 }
 0x4bd   :  { %v1248_v44 = vadd.f32 %v1394_v42, %v1247_v43 }
 0x4be   :  { %v1607_v45 = vpop.f32.mrf.mxu1 }
 0x4bf   :  { %v1253_v46 = vadd.f32 %v1248_v44, %v1909_v60 }
 0x4c0   :  { %v1250_v47 = vpop.f32.mrf.mxu1 }
 0x4c1   :  { %v1254_v48 = vmax.f32 %v1253_v46, 0.0 }
 0x4c2   :  { %v1608_v49 = vpop.f32.mrf.mxu1 }
 0x4c3   :  { %v1261_v50 = vmul.f32 %v1403_v21, %v1254_v48 }
 0x4c5   :  { %1262 = vadd.xlane.f32.xlu0 %v1261_v50 }
 0x54e   :  { %v1263_v52 = vpop.xlane.xlu0 %1262 }
 0x54f   :  { %v1268_v53 = vadd.f32 %v1404_v51, %v1263_v52 }
 0x551   :  { %1270 = vst.msk [vmem:[%s1941_s4] sm:$0xff] %vm1269_vm1, %v1268_v53 }
 0x552   :  { %1275 = vsyncpa [#allocation3], 1 }
 0x553   :  { %1276 = vsyncpa [#allocation5], 1 }
 0x554   :  { %1277 = vsyncpa [#allocation8], 1 }

</bundles_post_ra>
